<compile_context>
chip_gen: v7x
topology: tpu7x:2x2x1
jax: 0.10.0
libtpu: 0.0.40
codegen_flags: <defaults>
</compile_context>

<pallas_src>
import jax
import jax.numpy as jnp
from jax.experimental import pallas as pl
from jax.experimental.pallas import tpu as pltpu

INPUT_SIZE = 2
HIDDEN_SIZE = 2
OUTPUT_SIZE = 1
LANE = 128


def _round_up(n, m):
    return ((n + m - 1) // m) * m


def perceptron_kernel(w1_ref, b1_ref, w2_ref, b2_ref, x_ref, o_ref):
    # x_ref: (INPUT_SIZE, TILE_B) f32 in VMEM, batch on lanes.
    # w1_ref: (INPUT_SIZE, HIDDEN_SIZE), b1_ref: (HIDDEN_SIZE,) in SMEM.
    # w2_ref: (HIDDEN_SIZE, OUTPUT_SIZE), b2_ref: (OUTPUT_SIZE,) in SMEM.
    x0 = x_ref[0:1, :]  # (1, TILE_B)
    x1 = x_ref[1:2, :]  # (1, TILE_B)

    # Hidden layer: h_j = sigmoid(w1[0,j]*x0 + w1[1,j]*x1 + b1[j])  (VPU + EUP)
    h0 = jax.nn.sigmoid(w1_ref[0, 0] * x0 + w1_ref[1, 0] * x1 + b1_ref[0])
    h1 = jax.nn.sigmoid(w1_ref[0, 1] * x0 + w1_ref[1, 1] * x1 + b1_ref[1])

    # Output layer: y = sigmoid(w2[0]*h0 + w2[1]*h1 + b2)
    y = jax.nn.sigmoid(w2_ref[0, 0] * h0 + w2_ref[1, 0] * h1 + b2_ref[0])

    # (OUTPUT_SIZE, TILE_B) lane-dense, unmasked store.
    o_ref[...] = y.astype(o_ref.dtype)


def perceptron_forward(x, w1, b1, w2, b2, *, tile_b=4096):
    """x: (B, INPUT_SIZE) f32.  w1: (in, hidden), b1: (hidden,),
    w2: (hidden, out), b2: (out,)  (weights pre-transposed vs torch Linear)."""
    B = x.shape[0]
    # Lane-aligned batch tile; never tile beyond what the padded batch needs.
    tb = min(_round_up(tile_b, LANE), _round_up(B, LANE))
    B_pad = _round_up(B, tb)

    # Transpose to feature-on-sublane / batch-on-lane layout, pad batch to tile.
    x_t = jnp.pad(x.astype(jnp.float32), ((0, B_pad - B), (0, 0))).T  # (IN, B_pad)

    smem = pl.BlockSpec(memory_space=pltpu.MemorySpace.SMEM)

    out_t = pl.pallas_call(
        perceptron_kernel,
        out_shape=jax.ShapeDtypeStruct((OUTPUT_SIZE, B_pad), jnp.float32),
        grid=(B_pad // tb,),
        in_specs=[
            smem,  # w1
            smem,  # b1
            smem,  # w2
            smem,  # b2
            # Feature axis at full extent (full-array exception), lane axis a
            # multiple of 128 -> layout-legal and lane-dense.
            pl.BlockSpec((INPUT_SIZE, tb), lambda i: (0, i)),
        ],
        out_specs=pl.BlockSpec((OUTPUT_SIZE, tb), lambda i: (0, i)),
        compiler_params=pltpu.CompilerParams(
            dimension_semantics=("parallel",)),
    )(w1, b1, w2, b2, x_t)

    return out_t[:, :B].T  # (B, OUTPUT_SIZE)


def reference_forward(x, w1, b1, w2, b2):
    h = jax.nn.sigmoid(x @ w1 + b1[None, :])
    return jax.nn.sigmoid(h @ w2 + b2[None, :])


if __name__ == "__main__":
    key = jax.random.PRNGKey(0)
    kx, k1, k2, k3, k4 = jax.random.split(key, 5)

    batch = 8
    x = jax.random.normal(kx, (batch, INPUT_SIZE), dtype=jnp.float32)
    # Torch Linear weights are (out, in); stored pre-transposed as (in, out).
    w1 = jax.random.normal(k1, (INPUT_SIZE, HIDDEN_SIZE), dtype=jnp.float32) * 0.5
    b1 = jax.random.normal(k2, (HIDDEN_SIZE,), dtype=jnp.float32) * 0.1
    w2 = jax.random.normal(k3, (HIDDEN_SIZE, OUTPUT_SIZE), dtype=jnp.float32) * 0.5
    b2 = jax.random.normal(k4, (OUTPUT_SIZE,), dtype=jnp.float32) * 0.1

    out = perceptron_forward(x, w1, b1, w2, b2)
    out = jax.block_until_ready(out)

    ref = reference_forward(x, w1, b1, w2, b2)
    assert out.shape == (batch, OUTPUT_SIZE)
    assert jnp.allclose(out, ref, atol=1e-5, rtol=1e-5), "mismatch vs reference"

    print("KERNEL_OK")
</pallas_src>

<mosaic_0001>
module attributes {stable_mosaic.version = 11 : i64} {
  func.func @perceptron_kernel(%arg0: i32, %arg1: memref<2x2xf32, #tpu.memory_space<smem>>, %arg2: memref<2xf32, #tpu.memory_space<smem>>, %arg3: memref<2x1xf32, #tpu.memory_space<smem>>, %arg4: memref<1xf32, #tpu.memory_space<smem>>, %arg5: memref<2x128xf32, #tpu.memory_space<vmem>>, %arg6: memref<1x128xf32, #tpu.memory_space<vmem>>) attributes {dimension_semantics = [#tpu.dimension_semantics<parallel>], iteration_bounds = array<i64: 1>, scalar_prefetch = 0 : i64, scratch_operands = 0 : i64, tpu.core_type = #tpu.core_type<tc>, window_params = [{transform_indices = @transform_0, window_bounds = array<i64: 2, 2>}, {transform_indices = @transform_1, window_bounds = array<i64: 2>}, {transform_indices = @transform_2, window_bounds = array<i64: 2, 1>}, {transform_indices = @transform_3, window_bounds = array<i64: 1>}, {transform_indices = @transform_4, window_bounds = array<i64: 2, 128>}, {transform_indices = @transform_5, window_bounds = array<i64: 1, 128>}]} {
    %c0 = arith.constant 0 : index
    %c0_0 = arith.constant 0 : index
    %0 = vector.load %arg5[%c0, %c0_0] : memref<2x128xf32, #tpu.memory_space<vmem>>, vector<1x128xf32>
    %c1 = arith.constant 1 : index
    %c0_1 = arith.constant 0 : index
    %1 = vector.load %arg5[%c1, %c0_1] : memref<2x128xf32, #tpu.memory_space<vmem>>, vector<1x128xf32>
    %c0_2 = arith.constant 0 : index
    %c0_3 = arith.constant 0 : index
    %2 = memref.load %arg1[%c0_2, %c0_3] : memref<2x2xf32, #tpu.memory_space<smem>>
    %3 = vector.broadcast %2 : f32 to vector<1x128xf32>
    %4 = arith.mulf %3, %0 : vector<1x128xf32>
    %c1_4 = arith.constant 1 : index
    %c0_5 = arith.constant 0 : index
    %5 = memref.load %arg1[%c1_4, %c0_5] : memref<2x2xf32, #tpu.memory_space<smem>>
    %6 = vector.broadcast %5 : f32 to vector<1x128xf32>
    %7 = arith.mulf %6, %1 : vector<1x128xf32>
    %8 = arith.addf %4, %7 : vector<1x128xf32>
    %c0_6 = arith.constant 0 : index
    %9 = memref.load %arg2[%c0_6] : memref<2xf32, #tpu.memory_space<smem>>
    %10 = vector.broadcast %9 : f32 to vector<1x128xf32>
    %11 = arith.addf %8, %10 : vector<1x128xf32>
    %12 = arith.negf %11 : vector<1x128xf32>
    %13 = math.exp %12 : vector<1x128xf32>
    %cst = arith.constant 1.000000e+00 : f32
    %14 = vector.broadcast %cst : f32 to vector<1x128xf32>
    %15 = arith.addf %14, %13 : vector<1x128xf32>
    %16 = arith.divf %14, %15 : vector<1x128xf32>
    %c0_7 = arith.constant 0 : index
    %c1_8 = arith.constant 1 : index
    %17 = memref.load %arg1[%c0_7, %c1_8] : memref<2x2xf32, #tpu.memory_space<smem>>
    %18 = vector.broadcast %17 : f32 to vector<1x128xf32>
    %19 = arith.mulf %18, %0 : vector<1x128xf32>
    %c1_9 = arith.constant 1 : index
    %c1_10 = arith.constant 1 : index
    %20 = memref.load %arg1[%c1_9, %c1_10] : memref<2x2xf32, #tpu.memory_space<smem>>
    %21 = vector.broadcast %20 : f32 to vector<1x128xf32>
    %22 = arith.mulf %21, %1 : vector<1x128xf32>
    %23 = arith.addf %19, %22 : vector<1x128xf32>
    %c1_11 = arith.constant 1 : index
    %24 = memref.load %arg2[%c1_11] : memref<2xf32, #tpu.memory_space<smem>>
    %25 = vector.broadcast %24 : f32 to vector<1x128xf32>
    %26 = arith.addf %23, %25 : vector<1x128xf32>
    %27 = arith.negf %26 : vector<1x128xf32>
    %28 = math.exp %27 : vector<1x128xf32>
    %cst_12 = arith.constant 1.000000e+00 : f32
    %29 = vector.broadcast %cst_12 : f32 to vector<1x128xf32>
    %30 = arith.addf %29, %28 : vector<1x128xf32>
    %31 = arith.divf %29, %30 : vector<1x128xf32>
    %c0_13 = arith.constant 0 : index
    %c0_14 = arith.constant 0 : index
    %32 = memref.load %arg3[%c0_13, %c0_14] : memref<2x1xf32, #tpu.memory_space<smem>>
    %33 = vector.broadcast %32 : f32 to vector<1x128xf32>
    %34 = arith.mulf %33, %16 : vector<1x128xf32>
    %c1_15 = arith.constant 1 : index
    %c0_16 = arith.constant 0 : index
    %35 = memref.load %arg3[%c1_15, %c0_16] : memref<2x1xf32, #tpu.memory_space<smem>>
    %36 = vector.broadcast %35 : f32 to vector<1x128xf32>
    %37 = arith.mulf %36, %31 : vector<1x128xf32>
    %38 = arith.addf %34, %37 : vector<1x128xf32>
    %c0_17 = arith.constant 0 : index
    %39 = memref.load %arg4[%c0_17] : memref<1xf32, #tpu.memory_space<smem>>
    %40 = vector.broadcast %39 : f32 to vector<1x128xf32>
    %41 = arith.addf %38, %40 : vector<1x128xf32>
    %42 = arith.negf %41 : vector<1x128xf32>
    %43 = math.exp %42 : vector<1x128xf32>
    %cst_18 = arith.constant 1.000000e+00 : f32
    %44 = vector.broadcast %cst_18 : f32 to vector<1x128xf32>
    %45 = arith.addf %44, %43 : vector<1x128xf32>
    %46 = arith.divf %44, %45 : vector<1x128xf32>
    %c0_19 = arith.constant 0 : index
    %c0_20 = arith.constant 0 : index
    %47 = vector.load %arg6[%c0_19, %c0_20] : memref<1x128xf32, #tpu.memory_space<vmem>>, vector<1x128xf32>
    tpu.vector_store %arg6[%c0_19, %c0_20], %46 {strides = array<i32>} : memref<1x128xf32, #tpu.memory_space<vmem>>, vector<1x128xf32>,
    return
  }
  func.func @transform_0(%arg0: i32) -> (i32, i32) {
    %c0_i32 = arith.constant 0 : i32
    %c0_i32_0 = arith.constant 0 : i32
    %c0_i32_1 = arith.constant 0 : i32
    return %c0_i32, %c0_i32_0 : i32, i32
  }
  func.func @transform_1(%arg0: i32) -> i32 {
    %c0_i32 = arith.constant 0 : i32
    %c0_i32_0 = arith.constant 0 : i32
    return %c0_i32 : i32
  }
  func.func @transform_2(%arg0: i32) -> (i32, i32) {
    %c0_i32 = arith.constant 0 : i32
    %c0_i32_0 = arith.constant 0 : i32
    %c0_i32_1 = arith.constant 0 : i32
    return %c0_i32, %c0_i32_0 : i32, i32
  }
  func.func @transform_3(%arg0: i32) -> i32 {
    %c0_i32 = arith.constant 0 : i32
    %c0_i32_0 = arith.constant 0 : i32
    return %c0_i32 : i32
  }
  func.func @transform_4(%arg0: i32) -> (i32, i32) {
    %c0_i32 = arith.constant 0 : i32
    %c0_i32_0 = arith.constant 0 : i32
    return %c0_i32, %arg0 : i32, i32
  }
  func.func @transform_5(%arg0: i32) -> (i32, i32) {
    %c0_i32 = arith.constant 0 : i32
    %c0_i32_0 = arith.constant 0 : i32
    return %c0_i32, %arg0 : i32, i32
  }
}

</mosaic_0001>

<bundles_post_ra>
// kernel: tpu_custom_call.1
= control target key start
LH: loop header
LB: loop body
LE: loop exit
PB: predicated region body
PF: predicated region fallthrough
CT: control target
= control target key end

     0   :  { %11 = vsyncpa [#allocation5], 0  ;;  %s277_s0 = inlined_call_operand.vmem [shape: f32[2,2], index: 0, kind: input, shape index: {}]   ;;  %s278_s1 = inlined_call_operand.vmem [shape: f32[2], index: 1, kind: input, shape index: {}]   ;;  %s279_s2 = inlined_call_operand.vmem [shape: f32[2,1], index: 2, kind: input, shape index: {}]   ;;  %s280_s3 = inlined_call_operand.<no memory space> [shape: f32[1], index: 3, kind: input, shape index: {}]   ;;  %s281_s4 = inlined_call_operand.vmem [shape: f32[2,128], index: 4, kind: input, shape index: {}]   ;;  %s282_s5 = inlined_call_operand.hbm [shape: f32[1,128], index: 5, kind: output, shape index: {}]  }
   0x1   :  { %12 = vsyncpa [#allocation7], 0  ;;  %s30_s20 = sshll.u32 %s278_s1, 4  ;;  %s31_s20 = int_to_ptr.vmem [resolvable:$true] %s30_s20 }
   0x2   :  { %13 = vsyncpa [#allocation4], 0  ;;  %s20_s23 = sshll.u32 %s277_s0, 4  ;;  %s149_s24 = scalar_lea.vmem %s31_s20, 16  ;;  %s21_s23 = int_to_ptr.vmem [resolvable:$true] %s20_s23 }
   0x3   :  { %p150_p0 = scmp.ne.s32.totalorder %s31_s20, %s149_s24  ;;  %p154_p1 = scmp.lt.s32.totalorder %s31_s20, %s31_s20 }
   0x4   :  { %p155_p2 = scmp.lt.s32.totalorder %s149_s24, %s149_s24 }
   0x6   :  { %p156_p3 = por %p155_p2, %p154_p1 }
   0x8   :  { %p157_p4 = pnand %p156_p3, %p150_p0 }
   0xa   :  { %160 = shalt.err (!%p157_p4)
}
   0xb   :  { %s213_s25 = smov [#allocation6]   ;;  %s161_s26 = scalar_lea.vmem %s21_s23, 32 }
   0xc   :  { %33 = dma.vmem_to_smem %s31_s20, 16, %s213_s25, [#allocation7]  }
   0xd   :  { %p162_p5 = scmp.ne.s32.totalorder %s21_s23, %s161_s26  ;;  %p166_p6 = scmp.lt.s32.totalorder %s21_s23, %s21_s23 }
   0xe   :  { %p167_p7 = scmp.lt.s32.totalorder %s161_s26, %s161_s26 }
  0x10   :  { %p168_p8 = por %p167_p7, %p166_p6 }
  0x12   :  { %p169_p9 = pnand %p168_p8, %p162_p5 }
  0x14   :  { %172 = shalt.err (!%p169_p9)
}
  0x15   :  { %s214_s1 = smov [#allocation3]   ;;  %s40_s28 = sshll.u32 %s279_s2, 4  ;;  %s41_s28 = int_to_ptr.vmem [resolvable:$true] %s40_s28 }
  0x16   :  { %23 = dma.vmem_to_smem %s21_s23, 32, %s214_s1, [#allocation5]  }
  0x17   :  { %s173_s29 = scalar_lea.vmem %s41_s28, 32  ;;  %p178_p11 = scmp.lt.s32.totalorder %s41_s28, %s41_s28 }
  0x18   :  { %p174_p10 = scmp.ne.s32.totalorder %s41_s28, %s173_s29  ;;  %p179_p12 = scmp.lt.s32.totalorder %s173_s29, %s173_s29 }
  0x1a   :  { %p180_p13 = por %p179_p12, %p178_p11 }
  0x1c   :  { %p181_p0 = pnand %p180_p13, %p174_p10 }
  0x1e   :  { %184 = shalt.err (!%p181_p0)
}
  0x1f   :  { %s215_s30 = smov [#allocation8]  }
  0x20   :  { %43 = dma.vmem_to_smem %s41_s28, 32, %s215_s30, [#allocation7]  }
  0x21   :  { %207 = dma.done.wait [#allocation5], 32  }
  0x22   :  { %208 = vsyncadd [#allocation5], 4294967264 }
  0x23   :  { %209 = dma.done.wait [#allocation7], 48  }
  0x24   :  { %210 = vsyncadd [#allocation7], 4294967248 }
  0x25   :  { %57 = sfence }
  0x26   :  { %s60_s6 = sld [smem:[#allocation3]]  ;;  %s127_s9 = sld [smem:[#allocation3 + $0x1]]  ;;  %v58_v0 = vld [vmem:[%s281_s4] sm:$0x1]  ;;  %v59_v1 = vld [vmem:[%s281_s4 + $0x1] sm:$0x1]  ;;  %v100_v28 = vstv %s280_s3 }
  0x27   :  { %s125_s7 = sld [smem:[#allocation3 + $0x80]]  ;;  %s128_s2 = sld [smem:[#allocation3 + $0x81]] }
  0x28   :  { %s67_s8 = sld [smem:[#allocation6]]  ;;  %s129_s10 = sld [smem:[#allocation6 + $0x1]] }
  0x29   :  { %s92_s4 = sld [smem:[#allocation8]]  ;;  %s216_s18 = smov [#allocation9]  }
  0x2a   :  { %s131_s15 = sld [smem:[#allocation8 + $0x80]]  ;;  %s115_s19 = sshll.u32 %s216_s18, 4  ;;  %s116_s19 = int_to_ptr.vmem [resolvable:$true] %s115_s19 }
  0x2b   :  { %s185_s20 = scalar_lea.vmem %s116_s19, 16  ;;  %s189_s21 = scalar_lea.vmem %s116_s19, 32 }
  0x2c   :  { %v61_v2 = vstv %s60_s6  ;;  %v77_v6 = vstv %s127_s9  ;;  %p186_p1 = scmp.ne.s32.totalorder %s116_s19, %s185_s20  ;;  %p190_p2 = scmp.lt.s32.totalorder %s116_s19, %s116_s19 }
  0x2d   :  { %v62_v3 = vmul.f32 %v61_v2, %v58_v0  ;;  %v64_v4 = vstv %s125_s7  ;;  %v80_v7 = vstv %s128_s2  ;;  %v78_v9 = vmul.f32 %v77_v6, %v58_v0  ;;  %p191_p3 = scmp.lt.s32.totalorder %s189_s21, %s185_s20 }
  0x2e   :  { %v65_v5 = vmul.f32 %v64_v4, %v59_v1  ;;  %v68_v8 = vstv %s67_s8  ;;  %v81_v10 = vmul.f32 %v80_v7, %v59_v1  ;;  %v84_v12 = vstv %s129_s10 }
  0x2f   :  { %v93_v22 = vstv %s92_s4  ;;  %p192_p4 = por %p191_p3, %p190_p2 }
  0x30   :  { %v66_v11 = vadd.f32 %v65_v5, %v62_v3  ;;  %v82_v13 = vadd.f32 %v81_v10, %v78_v9  ;;  %v96_v23 = vstv %s131_s15 }
  0x31   :  { %p193_p5 = pnand %p192_p4, %p186_p1 }
  0x32   :  { %v69_v14 = vadd.f32 %v68_v8, %v66_v11  ;;  %v85_v15 = vadd.f32 %v84_v12, %v82_v13 }
  0x34   :  { %v126_v16 = vmul.f32 -1.442695, %v69_v14  ;;  %v130_v17 = vmul.f32 -1.442695, %v85_v15 }
  0x36   :  { %137 = vpow2.f32 %v126_v16 }
  0x37   :  { %139 = vpow2.f32 %v130_v17 }
  0x40   :  { %v138_v18 = vpop.eup %137 }
  0x41   :  { %v140_v19 = vpop.eup %139  ;;  %v73_v20 = vadd.f32 1.0, %v138_v18 }
  0x42   :  { %v89_v21 = vadd.f32 1.0, %v140_v19 }
  0x43   :  { %141 = vrcp.f32 %v73_v20 }
  0x44   :  { %143 = vrcp.f32 %v89_v21 }
  0x4d   :  { %v142_v24 = vpop.eup %141 }
  0x4e   :  { %v144_v25 = vpop.eup %143  ;;  %v94_v26 = vmul.f32 %v142_v24, %v93_v22 }
  0x4f   :  { %v97_v27 = vmul.f32 %v144_v25, %v96_v23 }
  0x51   :  { %v98_v29 = vadd.f32 %v97_v27, %v94_v26 }
  0x53   :  { %v101_v30 = vadd.f32 %v100_v28, %v98_v29 }
  0x55   :  { %v132_v31 = vmul.f32 -1.442695, %v101_v30 }
  0x57   :  { %145 = vpow2.f32 %v132_v31 }
  0x61   :  { %v146_v32 = vpop.eup %145 }
  0x62   :  { %v105_v33 = vadd.f32 1.0, %v146_v32 }
  0x64   :  { %147 = vrcp.f32 %v105_v33 }
  0x6e   :  { %v148_v34 = vpop.eup %147 }
  0x6f   :  { %108 = vst [vmem:[#allocation9] sm:$0x1] %v148_v34 }
  0x70   :  { %196 = shalt.err (!%p193_p5)
}
  0x71   :  { %s197_s23 = scalar_lea.hbm %s282_s5, 16 }
  0x72   :  { %p198_p6 = scmp.ne.s32.totalorder %s282_s5, %s197_s23  ;;  %p201_p7 = scmp.lt.u32.totalorder %s197_s23, %s282_s5 }
  0x74   :  { %p203_p8 = pnand %p201_p7, %p198_p6 }
  0x76   :  { %206 = shalt.err (!%p203_p8)
}
  0x77   :  { %118 = dma.vmem_to_hbm [thread:$0]  %s116_s19, 16, %s282_s5, [#allocation4]  }
  0x78   :  { %211 = dma.done.wait [#allocation4], 16  }
  0x79   :  { %212 = vsyncadd [#allocation4], 4294967280 }
  0x7a   :  { %122 = vsyncpa [#allocation4], 1 }
  0x7b   :  { %123 = vsyncpa [#allocation5], 1 }
  0x7c   :  { %124 = vsyncpa [#allocation7], 1 }

</bundles_post_ra>
